<compile_context>
chip_gen: v7x
topology: tpu7x:2x2x1
jax: 0.10.0
libtpu: 0.0.40
codegen_flags: <defaults>
</compile_context>

<pallas_src>
import functools

import jax
import jax.numpy as jnp
from jax.experimental import pallas as pl
from jax.experimental.pallas import tpu as pltpu


def _neg_sampling_loss_kernel(in_ref, out_ref, noise_ref, loss_ref, acc_ref,
                              *, total_b, tile_b):
    # in_ref:    (TB, E)    VMEM f32
    # out_ref:   (TB, E)    VMEM f32
    # noise_ref: (TB, N, E) VMEM f32
    # loss_ref:  (1, 1)     SMEM f32 output (written on the last grid step)
    # acc_ref:   (1,)       SMEM f32 scratch accumulator
    i = pl.program_id(0)

    @pl.when(i == 0)
    def _():
        acc_ref[0] = 0.0

    x = in_ref[...]        # (TB, E)
    o = out_ref[...]       # (TB, E)
    nz = noise_ref[...]    # (TB, N, E)

    # Positive-sample term: rowwise dot over E (lane reduction).
    out_dot = jnp.sum(o * x, axis=-1, keepdims=True)                 # (TB, 1)
    out_loss = jax.nn.log_sigmoid(out_dot)                           # (TB, 1)

    # Negative-sample term. Do NOT negate the full (TB,N,E) tensor; negate the
    # (TB,N) reduction result instead (saves B*N*E VALU ops).
    noise_dot = jnp.sum(nz * x[:, None, :], axis=-1)                 # (TB, N)
    noise_loss = jnp.sum(jax.nn.log_sigmoid(-noise_dot),
                         axis=-1, keepdims=True)                     # (TB, 1)

    # Mask out rows that are only batch padding (global row >= total_b).
    row = jax.lax.broadcasted_iota(jnp.int32, (tile_b, 1), 0)        # (TB, 1)
    valid = (i * tile_b + row) < total_b
    tile_sum = jnp.sum(jnp.where(valid, out_loss + noise_loss, 0.0))

    acc_ref[0] += tile_sum

    @pl.when(i == pl.num_programs(0) - 1)
    def _():
        loss_ref[0, 0] = -(acc_ref[0] / jnp.float32(total_b))


def _choose_tile_b(batch, num_noise, embed, vmem_budget_bytes):
    """Largest sublane-aligned batch tile whose double-buffered blocks fit the budget."""
    # f32 bytes per batch row, x2 for double buffering: noise (N*E) + input (E) + output (E).
    bytes_per_row = 2 * 4 * (num_noise * embed + 2 * embed)
    tb = vmem_budget_bytes // max(bytes_per_row, 1)
    tb = max(8, (tb // 8) * 8)                       # multiple of 8 (sublane)
    padded_b = ((batch + 7) // 8) * 8
    return min(tb, padded_b)


def negative_sampling_loss(input_vectors, output_vectors, noise_vectors,
                           *, vmem_budget_bytes=12 * 1024 * 1024):
    """Pallas implementation of NegativeSamplingLoss.forward. Returns a scalar.

    vmem_budget_bytes: VMEM budget for the double-buffered input blocks. The
    12 MiB default fits every generation's scoped-VMEM default (16 MiB v5e,
    32 MiB v6e/v7x); raise it (e.g. 24-48 MiB) on v6e for better HBM roofline.
    """
    assert input_vectors.ndim == 2 and output_vectors.shape == input_vectors.shape
    assert noise_vectors.ndim == 3
    B, E = input_vectors.shape
    Bn, N, En = noise_vectors.shape
    assert Bn == B and En == E

    x = input_vectors.astype(jnp.float32)
    o = output_vectors.astype(jnp.float32)
    nz = noise_vectors.astype(jnp.float32)

    tb = _choose_tile_b(B, N, E, vmem_budget_bytes)
    padded_b = ((B + tb - 1) // tb) * tb
    if padded_b != B:
        pad = padded_b - B
        x = jnp.pad(x, ((0, pad), (0, 0)))
        o = jnp.pad(o, ((0, pad), (0, 0)))
        nz = jnp.pad(nz, ((0, pad), (0, 0), (0, 0)))

    grid = (padded_b // tb,)
    kernel = functools.partial(_neg_sampling_loss_kernel, total_b=B, tile_b=tb)

    cost = pl.CostEstimate(
        flops=2 * B * (N + 1) * E + 4 * B * (N + 1),
        transcendentals=2 * B * (N + 1),
        bytes_accessed=4 * (B * N * E + 2 * B * E) + 4,
    )

    loss = pl.pallas_call(
        kernel,
        out_shape=jax.ShapeDtypeStruct((1, 1), jnp.float32),
        grid=grid,
        in_specs=[
            pl.BlockSpec((tb, E), lambda i: (i, 0)),
            pl.BlockSpec((tb, E), lambda i: (i, 0)),
            pl.BlockSpec((tb, N, E), lambda i: (i, 0, 0)),
        ],
        out_specs=pl.BlockSpec(memory_space=pltpu.MemorySpace.SMEM),
        scratch_shapes=[pltpu.SMEM((1,), jnp.float32)],
        compiler_params=pltpu.CompilerParams(
            dimension_semantics=("arbitrary",),  # grid axis is a reduction
        ),
        cost_estimate=cost,
    )(x, o, nz)
    return loss[0, 0]


def _reference_loss(input_vectors, output_vectors, noise_vectors):
    # Pure-JAX reference mirroring the PyTorch forward exactly.
    out_dot = jnp.sum(output_vectors * input_vectors, axis=-1)              # (B,)
    out_loss = jnp.log(jax.nn.sigmoid(out_dot))
    noise_dot = jnp.einsum("bne,be->bn", -noise_vectors, input_vectors)     # (B, N)
    noise_loss = jnp.sum(jnp.log(jax.nn.sigmoid(noise_dot)), axis=1)        # (B,)
    return -jnp.mean(out_loss + noise_loss)


if __name__ == "__main__":
    key = jax.random.PRNGKey(0)

    # Small test consistent with the module: batch=8, embed=32, 4 negatives.
    B, E, N = 8, 32, 4
    k_in, k_out, k_noise = jax.random.split(key, 3)
    input_vectors = 0.1 * jax.random.normal(k_in, (B, E), dtype=jnp.float32)
    output_vectors = 0.1 * jax.random.normal(k_out, (B, E), dtype=jnp.float32)
    noise_vectors = 0.1 * jax.random.normal(k_noise, (B, N, E), dtype=jnp.float32)

    loss = negative_sampling_loss(input_vectors, output_vectors, noise_vectors)
    loss = jax.block_until_ready(loss)
    ref = _reference_loss(input_vectors, output_vectors, noise_vectors)
    assert jnp.allclose(loss, ref, rtol=1e-4, atol=1e-5), (loss, ref)

    # Exercise the multi-tile / ragged-batch path (tiny VMEM budget forces
    # tb=8, B=20 pads to 24 rows -> 3 grid steps with masked padding rows).
    B2 = 20
    k_in2, k_out2, k_noise2 = jax.random.split(jax.random.PRNGKey(1), 3)
    iv2 = 0.1 * jax.random.normal(k_in2, (B2, E), dtype=jnp.float32)
    ov2 = 0.1 * jax.random.normal(k_out2, (B2, E), dtype=jnp.float32)
    nv2 = 0.1 * jax.random.normal(k_noise2, (B2, N, E), dtype=jnp.float32)
    loss2 = negative_sampling_loss(iv2, ov2, nv2, vmem_budget_bytes=2048)
    loss2 = jax.block_until_ready(loss2)
    ref2 = _reference_loss(iv2, ov2, nv2)
    assert jnp.allclose(loss2, ref2, rtol=1e-4, atol=1e-5), (loss2, ref2)

    print("KERNEL_OK")
</pallas_src>

<mosaic_0001>
module attributes {stable_mosaic.version = 11 : i64} {
  func.func @_neg_sampling_loss_kernel(%arg0: i32, %arg1: memref<8x32xf32, #tpu.memory_space<vmem>>, %arg2: memref<8x32xf32, #tpu.memory_space<vmem>>, %arg3: memref<8x4x32xf32, #tpu.memory_space<vmem>>, %arg4: memref<1x1xf32, #tpu.memory_space<smem>>, %arg5: memref<1xf32, #tpu.memory_space<smem>>) attributes {dimension_semantics = [#tpu.dimension_semantics<arbitrary>], iteration_bounds = array<i64: 1>, scalar_prefetch = 0 : i64, scratch_operands = 1 : i64, tpu.core_type = #tpu.core_type<tc>, window_params = [{transform_indices = @transform_0, window_bounds = array<i64: 8, 32>}, {transform_indices = @transform_1, window_bounds = array<i64: 8, 32>}, {transform_indices = @transform_2, window_bounds = array<i64: 8, 4, 32>}, {transform_indices = @transform_3, window_bounds = array<i64: 1, 1>}]} {
    %c0_i32 = arith.constant 0 : i32
    %0 = arith.cmpi eq, %arg0, %c0_i32 : i32
    %1 = arith.extui %0 : i1 to i32
    %c0_i32_0 = arith.constant 0 : i32
    %2 = arith.cmpi ne, %1, %c0_i32_0 : i32
    scf.if %2 {
      %cst_25 = arith.constant 0.000000e+00 : f32
      %c0_26 = arith.constant 0 : index
      %72 = memref.load %arg5[%c0_26] : memref<1xf32, #tpu.memory_space<smem>>
      memref.store %cst_25, %arg5[%c0_26] : memref<1xf32, #tpu.memory_space<smem>>
    } else {
    }
    %c0 = arith.constant 0 : index
    %c0_1 = arith.constant 0 : index
    %3 = vector.load %arg1[%c0, %c0_1] : memref<8x32xf32, #tpu.memory_space<vmem>>, vector<8x32xf32>
    %c0_2 = arith.constant 0 : index
    %c0_3 = arith.constant 0 : index
    %4 = vector.load %arg2[%c0_2, %c0_3] : memref<8x32xf32, #tpu.memory_space<vmem>>, vector<8x32xf32>
    %c0_4 = arith.constant 0 : index
    %c0_5 = arith.constant 0 : index
    %c0_6 = arith.constant 0 : index
    %5 = vector.load %arg3[%c0_4, %c0_5, %c0_6] : memref<8x4x32xf32, #tpu.memory_space<vmem>>, vector<8x4x32xf32>
    %6 = arith.mulf %4, %3 : vector<8x32xf32>
    %cst = arith.constant dense<0.000000e+00> : vector<8xf32>
    %7 = vector.multi_reduction <add>, %6, %cst [1] : vector<8x32xf32> to vector<8xf32>
    %8 = vector.shape_cast %7 : vector<8xf32> to vector<8x1xf32>
    %cst_7 = arith.constant 0.000000e+00 : f32
    %9 = vector.broadcast %cst_7 : f32 to vector<8x1xf32>
    %10 = arith.subf %9, %8 : vector<8x1xf32>
    %cst_8 = arith.constant 0.000000e+00 : f32
    %11 = vector.broadcast %cst_8 : f32 to vector<8x1xf32>
    %12 = arith.maximumf %10, %11 : vector<8x1xf32>
    %13 = vector.broadcast %cst_8 : f32 to vector<8x1xf32>
    %14 = arith.subf %10, %13 : vector<8x1xf32>
    %15 = arith.cmpf one, %14, %14 : vector<8x1xf32>
    %16 = vector.broadcast %cst_8 : f32 to vector<8x1xf32>
    %17 = arith.addf %10, %16 : vector<8x1xf32>
    %18 = math.absf %14 : vector<8x1xf32>
    %cst_9 = arith.constant 0.000000e+00 : f32
    %19 = vector.broadcast %cst_9 : f32 to vector<8x1xf32>
    %20 = arith.subf %19, %18 : vector<8x1xf32>
    %21 = math.exp %20 : vector<8x1xf32>
    %22 = math.log1p %21 : vector<8x1xf32>
    %23 = arith.addf %12, %22 : vector<8x1xf32>
    %24 = arith.select %15, %17, %23 : vector<8x1xi1>, vector<8x1xf32>
    %cst_10 = arith.constant 0.000000e+00 : f32
    %25 = vector.broadcast %cst_10 : f32 to vector<8x1xf32>
    %26 = arith.subf %25, %24 : vector<8x1xf32>
    %27 = vector.shape_cast %3 : vector<8x32xf32> to vector<8x1x32xf32>
    %28 = vector.broadcast %27 : vector<8x1x32xf32> to vector<8x4x32xf32>
    %29 = arith.mulf %5, %28 : vector<8x4x32xf32>
    %cst_11 = arith.constant dense<0.000000e+00> : vector<8x4xf32>
    %30 = vector.multi_reduction <add>, %29, %cst_11 [2] : vector<8x4x32xf32> to vector<8x4xf32>
    %cst_12 = arith.constant 0.000000e+00 : f32
    %31 = vector.broadcast %cst_12 : f32 to vector<8x4xf32>
    %32 = arith.subf %31, %30 : vector<8x4xf32>
    %cst_13 = arith.constant 0.000000e+00 : f32
    %33 = vector.broadcast %cst_13 : f32 to vector<8x4xf32>
    %34 = arith.subf %33, %32 : vector<8x4xf32>
    %cst_14 = arith.constant 0.000000e+00 : f32
    %35 = vector.broadcast %cst_14 : f32 to vector<8x4xf32>
    %36 = arith.maximumf %34, %35 : vector<8x4xf32>
    %37 = vector.broadcast %cst_14 : f32 to vector<8x4xf32>
    %38 = arith.subf %34, %37 : vector<8x4xf32>
    %39 = arith.cmpf one, %38, %38 : vector<8x4xf32>
    %40 = vector.broadcast %cst_14 : f32 to vector<8x4xf32>
    %41 = arith.addf %34, %40 : vector<8x4xf32>
    %42 = math.absf %38 : vector<8x4xf32>
    %cst_15 = arith.constant 0.000000e+00 : f32
    %43 = vector.broadcast %cst_15 : f32 to vector<8x4xf32>
    %44 = arith.subf %43, %42 : vector<8x4xf32>
    %45 = math.exp %44 : vector<8x4xf32>
    %46 = math.log1p %45 : vector<8x4xf32>
    %47 = arith.addf %36, %46 : vector<8x4xf32>
    %48 = arith.select %39, %41, %47 : vector<8x4xi1>, vector<8x4xf32>
    %cst_16 = arith.constant 0.000000e+00 : f32
    %49 = vector.broadcast %cst_16 : f32 to vector<8x4xf32>
    %50 = arith.subf %49, %48 : vector<8x4xf32>
    %cst_17 = arith.constant dense<0.000000e+00> : vector<8xf32>
    %51 = vector.multi_reduction <add>, %50, %cst_17 [1] : vector<8x4xf32> to vector<8xf32>
    %52 = vector.shape_cast %51 : vector<8xf32> to vector<8x1xf32>
    %53 = tpu.iota {dimensions = array<i32: 0>} : vector<8x1xi32>
    %c8_i32 = arith.constant 8 : i32
    %54 = arith.muli %arg0, %c8_i32 : i32
    %55 = vector.broadcast %54 : i32 to vector<8x1xi32>
    %56 = arith.addi %55, %53 : vector<8x1xi32>
    %c8_i32_18 = arith.constant 8 : i32
    %57 = vector.broadcast %c8_i32_18 : i32 to vector<8x1xi32>
    %58 = arith.cmpi slt, %56, %57 : vector<8x1xi32>
    %59 = arith.addf %26, %52 : vector<8x1xf32>
    %cst_19 = arith.constant 0.000000e+00 : f32
    %60 = vector.broadcast %cst_19 : f32 to vector<8x1xf32>
    %61 = arith.select %58, %59, %60 : vector<8x1xi1>, vector<8x1xf32>
    %62 = vector.shape_cast %61 : vector<8x1xf32> to vector<1x8x1xf32>
    %cst_20 = arith.constant dense<0.000000e+00> : vector<1xf32>
    %63 = vector.multi_reduction <add>, %62, %cst_20 [1, 2] : vector<1x8x1xf32> to vector<1xf32>
    %64 = vector.shape_cast %63 : vector<1xf32> to vector<1x1x1xf32>
    %65 = vector.extract %64[0, 0, 0] : f32 from vector<1x1x1xf32>
    %c0_21 = arith.constant 0 : index
    %66 = memref.load %arg5[%c0_21] : memref<1xf32, #tpu.memory_space<smem>>
    %67 = arith.addf %66, %65 : f32
    %c0_22 = arith.constant 0 : index
    %68 = memref.load %arg5[%c0_22] : memref<1xf32, #tpu.memory_space<smem>>
    memref.store %67, %arg5[%c0_22] : memref<1xf32, #tpu.memory_space<smem>>
    %c0_i32_23 = arith.constant 0 : i32
    %69 = arith.cmpi eq, %arg0, %c0_i32_23 : i32
    %70 = arith.extui %69 : i1 to i32
    %c0_i32_24 = arith.constant 0 : i32
    %71 = arith.cmpi ne, %70, %c0_i32_24 : i32
    scf.if %71 {
      %c0_25 = arith.constant 0 : index
      %72 = memref.load %arg5[%c0_25] : memref<1xf32, #tpu.memory_space<smem>>
      %cst_26 = arith.constant 8.000000e+00 : f32
      %73 = arith.divf %72, %cst_26 : f32
      %cst_27 = arith.constant 0.000000e+00 : f32
      %74 = arith.subf %cst_27, %73 : f32
      %c0_28 = arith.constant 0 : index
      %c0_29 = arith.constant 0 : index
      %75 = memref.load %arg4[%c0_28, %c0_29] : memref<1x1xf32, #tpu.memory_space<smem>>
      memref.store %74, %arg4[%c0_28, %c0_29] : memref<1x1xf32, #tpu.memory_space<smem>>
    } else {
    }
    return
  }
  func.func @transform_0(%arg0: i32) -> (i32, i32) {
    %c0_i32 = arith.constant 0 : i32
    %c0_i32_0 = arith.constant 0 : i32
    return %arg0, %c0_i32 : i32, i32
  }
  func.func @transform_1(%arg0: i32) -> (i32, i32) {
    %c0_i32 = arith.constant 0 : i32
    %c0_i32_0 = arith.constant 0 : i32
    return %arg0, %c0_i32 : i32, i32
  }
  func.func @transform_2(%arg0: i32) -> (i32, i32, i32) {
    %c0_i32 = arith.constant 0 : i32
    %c0_i32_0 = arith.constant 0 : i32
    %c0_i32_1 = arith.constant 0 : i32
    return %arg0, %c0_i32, %c0_i32_0 : i32, i32, i32
  }
  func.func @transform_3(%arg0: i32) -> (i32, i32) {
    %c0_i32 = arith.constant 0 : i32
    %c0_i32_0 = arith.constant 0 : i32
    %c0_i32_1 = arith.constant 0 : i32
    return %c0_i32, %c0_i32_0 : i32, i32
  }
}

</mosaic_0001>

<bundles_post_ra>
// kernel: tpu_custom_call.1
= control target key start
LH: loop header
LB: loop body
LE: loop exit
PB: predicated region body
PF: predicated region fallthrough
CT: control target
= control target key end

     0   :  { %8 = vsyncpa [#allocation4], 0  ;;  %s824_s0 = inlined_call_operand.hbm [shape: f32[8,32], index: 0, kind: input, shape index: {}]   ;;  %s825_s1 = inlined_call_operand.hbm [shape: f32[8,32], index: 1, kind: input, shape index: {}]   ;;  %s826_s2 = inlined_call_operand.hbm [shape: f32[8,4,32], index: 2, kind: input, shape index: {}]   ;;  %s827_s3 = inlined_call_operand.hbm [shape: f32[1,1], index: 3, kind: output, shape index: {}]  }
   0x1   :  { %9 = vsyncpa [#allocation7], 0 }
   0x2   :  { %10 = vsyncpa [#allocation5], 0  ;;  %s621_s12 = smov [#allocation6]   ;;  %s622_s14 = smov [#allocation3]  }
   0x3   :  { %s27_s13 = sshll.u32 %s621_s12, 4  ;;  %s17_s15 = sshll.u32 %s622_s14, 4  ;;  %s28_s13 = int_to_ptr.vmem [resolvable:$true] %s27_s13  ;;  %s18_s15 = int_to_ptr.vmem [resolvable:$true] %s17_s15 }
   0x4   :  { %s539_s18 = scalar_lea.hbm %s825_s1, 128 }
   0x5   :  { %p540_p0 = scmp.ne.s32.totalorder %s825_s1, %s539_s18  ;;  %p543_p1 = scmp.lt.u32.totalorder %s539_s18, %s825_s1 }
   0x7   :  { %p545_p2 = pnand %p543_p1, %p540_p0 }
   0x9   :  { %548 = shalt.err (!%p545_p2)
}
   0xa   :  { %s549_s23 = scalar_lea.vmem %s28_s13, 128  ;;  %p554_p4 = scmp.lt.s32.totalorder %s28_s13, %s28_s13 }
   0xb   :  { %p550_p3 = scmp.ne.s32.totalorder %s28_s13, %s549_s23  ;;  %p555_p5 = scmp.lt.s32.totalorder %s549_s23, %s549_s23 }
   0xd   :  { %p556_p6 = por %p555_p5, %p554_p4 }
   0xf   :  { %p557_p7 = pnand %p556_p6, %p550_p3 }
  0x11   :  { %560 = shalt.err (!%p557_p7)
}
  0x12   :  { %30 = dma.hbm_to_vmem [thread:$0]  %s825_s1, 128, %s28_s13, [#allocation7]  }
  0x13   :  { %s561_s28 = scalar_lea.hbm %s824_s0, 128 }
  0x14   :  { %p562_p8 = scmp.ne.s32.totalorder %s824_s0, %s561_s28  ;;  %p565_p9 = scmp.lt.u32.totalorder %s561_s28, %s824_s0 }
  0x16   :  { %p567_p10 = pnand %p565_p9, %p562_p8 }
  0x18   :  { %570 = shalt.err (!%p567_p10)
}
  0x19   :  { %s571_s6 = scalar_lea.vmem %s18_s15, 128  ;;  %p576_p12 = scmp.lt.s32.totalorder %s18_s15, %s18_s15 }
  0x1a   :  { %p572_p11 = scmp.ne.s32.totalorder %s18_s15, %s571_s6  ;;  %p577_p13 = scmp.lt.s32.totalorder %s571_s6, %s571_s6 }
  0x1c   :  { %p578_p0 = por %p577_p13, %p576_p12 }
  0x1e   :  { %p579_p1 = pnand %p578_p0, %p572_p11 }
  0x20   :  { %582 = shalt.err (!%p579_p1)
}
  0x21   :  { %20 = dma.hbm_to_vmem [thread:$0]  %s824_s0, 128, %s18_s15, [#allocation4]  }
  0x22   :  { %s623_s8 = smov [#allocation8]   ;;  %s583_s12 = scalar_lea.hbm %s826_s2, 512 }
  0x23   :  { %s36_s9 = sshll.u32 %s623_s8, 4  ;;  %p584_p2 = scmp.ne.s32.totalorder %s826_s2, %s583_s12  ;;  %s37_s9 = int_to_ptr.vmem [resolvable:$true] %s36_s9 }
  0x24   :  { %p587_p3 = scmp.lt.u32.totalorder %s583_s12, %s826_s2 }
  0x26   :  { %p589_p4 = pnand %p587_p3, %p584_p2 }
  0x28   :  { %592 = shalt.err (!%p589_p4)
}
  0x29   :  { %s593_s18 = scalar_lea.vmem %s37_s9, 512  ;;  %p598_p6 = scmp.lt.s32.totalorder %s37_s9, %s37_s9 }
  0x2a   :  { %p594_p5 = scmp.ne.s32.totalorder %s37_s9, %s593_s18  ;;  %p599_p7 = scmp.lt.s32.totalorder %s593_s18, %s593_s18 }
  0x2c   :  { %p600_p8 = por %p599_p7, %p598_p6 }
  0x2e   :  { %p601_p9 = pnand %p600_p8, %p594_p5 }
  0x30   :  { %604 = shalt.err (!%p601_p9)
}
  0x31   :  { %s624_s0 = smov 64   ;;  %s625_s15 = smov 4  }
  0x32   :  { %42 = dma.hbm_to_vmem [thread:$0]  %s826_s2, 512, %s37_s9, [#allocation7], %s624_s0, %s624_s0, %s625_s15  }
  0x33   :  { %615 = dma.done.wait [#allocation4], 128  }
  0x34   :  { %616 = vsyncadd [#allocation4], 4294967168 }
  0x35   :  { %617 = dma.done.wait [#allocation7], 640  }
  0x36   :  { %618 = vsyncadd [#allocation7], 4294966656  ;;  %v98_v0 = vlaneseq  ;;  %v626_v1 = vmov 1966171168   ;;  %v58_v8 = vld [vmem:[#allocation3] sm:$0xff]  ;;  %vm191_vm0 = vcmask 257024  }
  0x37   :  { %v96_v2 = vunpack.c.l.s4 %v626_v1  ;;  %v94_v11 = vcombine.high %v58_v8, %v58_v8  ;;  %v60_v15 = vld [vmem:[#allocation8] sm:$0xf]  ;;  %v62_v20 = vld [vmem:[#allocation8 + $0x8] sm:$0xf]  ;;  %v61_v21 = vld [vmem:[#allocation8 + $0x4] sm:$0xf] }
  0x38   :  { %v99_v3 = vshrl.u32 %v98_v0, 7  ;;  %v393_v4 = vand.u32 127, %v98_v0  ;;  %v64_v27 = vld [vmem:[#allocation8 + $0x10] sm:$0xf]  ;;  %v63_v28 = vld [vmem:[#allocation8 + $0xc] sm:$0xf] }
  0x39   :  { %v97_v5 = vunpack.c.0.s8 %v96_v2  ;;  %v65_v37 = vld [vmem:[#allocation8 + $0x14] sm:$0xf]  ;;  %v66_v44 = vld [vmem:[#allocation8 + $0x18] sm:$0xf]  ;;  %v67_v48 = vld [vmem:[#allocation8 + $0x1c] sm:$0xf] }
  0x3a   :  { %v684_v6 = vsub.s32 %v393_v4, %v99_v3  ;;  %v145_v10 = vsub.s32 0, %v99_v3  ;;  %v59_v51 = vld [vmem:[#allocation6] sm:$0xff]  ;;  %vm69_vm1 = vcmask 261120   ;;  %vm426_vm10 = vcmask 1041409   ;;  %s605_s25 = scalar_lea.hbm %s827_s3, 16 }
  0x3b   :  { %v100_v7 = vsub.s32 %v97_v5, %v99_v3  ;;  %v68_v55 = vmul.f32 %v59_v51, %v58_v8  ;;  %vm428_vm14 = vcmask 1042434   ;;  %p606_p10 = scmp.ne.s32.totalorder %s827_s3, %s605_s25  ;;  %p609_p11 = scmp.lt.u32.totalorder %s605_s25, %s827_s3 }
  0x3d   :  { %v101_v9 = vrot.slane %v58_v8, %v100_v7  ;;  %v108_v14 = vrot.slane %v94_v11, %v100_v7  ;;  %v70_v57 = vsel %vm69_vm1, %v68_v55, 0.0  ;;  %p611_p12 = pnand %p609_p11, %p606_p10 }
  0x3f   :  { %v117_v12 = vrot.slane %v101_v9, %v100_v7  ;;  %v109_v13 = vcombine.high %v101_v9, %v101_v9  ;;  %v124_v19 = vrot.slane %v108_v14, %v100_v7  ;;  %v110_v22 = vcombine.high %v108_v14, %v108_v14 }
  0x41   :  { %v146_v16 = vrot.slane %v117_v12, %v145_v10  ;;  %v139_v17 = vcombine.high %v117_v12, %v117_v12  ;;  %v131_v18 = vrot.slane %v109_v13, %v100_v7  ;;  %v162_v29 = vrot.slane %v124_v19, %v145_v10 }
  0x42   :  { %v138_v30 = vrot.slane %v110_v22, %v100_v7  ;;  %v140_v31 = vcombine.high %v124_v19, %v124_v19 }
  0x43   :  { %v183_v23 = vmul.f32 %v146_v16, %v60_v15  ;;  %v154_v24 = vrot.slane %v139_v17, %v145_v10  ;;  %v150_v25 = vrot.slane %v131_v18, %v145_v10  ;;  %v141_v26 = vcombine.high %v131_v18, %v131_v18 }
  0x44   :  { %v187_v36 = vmul.f32 %v162_v29, %v64_v27  ;;  %v166_v38 = vrot.slane %v138_v30, %v145_v10  ;;  %v142_v39 = vcombine.high %v138_v30, %v138_v30  ;;  %v170_v43 = vrot.slane %v140_v31, %v145_v10 }
  0x45   :  { %v192_v32 = vsel %vm191_vm0, %v183_v23, 0.0  ;;  %v185_v33 = vmul.f32 %v154_v24, %v62_v20  ;;  %v184_v34 = vmul.f32 %v150_v25, %v61_v21  ;;  %v158_v35 = vrot.slane %v141_v26, %v145_v10 }
  0x46   :  { %193 = vadd.xlane.f32.xlu0 %v192_v32  ;;  %v188_v46 = vmul.f32 %v166_v38, %v65_v37  ;;  %v174_v47 = vrot.slane %v142_v39, %v145_v10  ;;  %v204_v49 = vsel %vm191_vm0, %v187_v36, 0.0  ;;  %v189_v50 = vmul.f32 %v170_v43, %v66_v44 }
  0x47   :  { %v198_v40 = vsel %vm191_vm0, %v185_v33, 0.0  ;;  %v195_v41 = vsel %vm191_vm0, %v184_v34, 0.0  ;;  %v186_v42 = vmul.f32 %v158_v35, %v63_v28 }
  0x48   :  { %199 = vadd.xlane.f32.xlu1 %v198_v40  ;;  %v207_v52 = vsel %vm191_vm0, %v188_v46, 0.0  ;;  %v190_v53 = vmul.f32 %v174_v47, %v67_v48  ;;  %v210_v54 = vsel %vm191_vm0, %v189_v50, 0.0 }
  0x49   :  { %v201_v45 = vsel %vm191_vm0, %v186_v42, 0.0 }
  0x4a   :  { %196 = vadd.xlane.f32.xlu0 %v195_v41  ;;  %v213_v56 = vsel %vm191_vm0, %v190_v53, 0.0  ;;  %vm430_vm0 = vcmask 1043459  }
  0x4c   :  { %202 = vadd.xlane.f32.xlu1 %v201_v45 }
  0x4e   :  { %205 = vadd.xlane.f32.xlu0 %v204_v49 }
  0x50   :  { %208 = vadd.xlane.f32.xlu1 %v207_v52 }
  0x52   :  { %211 = vadd.xlane.f32.xlu0 %v210_v54 }
  0x54   :  { %214 = vadd.xlane.f32.xlu1 %v213_v56 }
  0x56   :  { %71 = vadd.xlane.f32.xlu0 %v70_v57 }
  0xd3   :  { %v194_v58 = vpop.xlane.xlu0 %193 }
  0xd4   :  { %v216_v59 = vsub.f32 0.0, %v194_v58 }
  0xd5   :  { %v200_v60 = vpop.xlane.xlu1 %199 }
  0xd6   :  { %v694_v61 = vsub.f32 0.0, %v216_v59  ;;  %v218_v62 = vsub.f32 0.0, %v200_v60 }
  0xd7   :  { %v197_v63 = vpop.xlane.xlu0 %196 }
  0xd8   :  { %v256_v0 = vand.u32 2147483647, %v694_v61  ;;  %v697_v1 = vsub.f32 0.0, %v218_v62  ;;  %v217_v2 = vsub.f32 0.0, %v197_v63  ;;  %v232_v55 = vmax.f32 %v694_v61, 0.0 }
  0xd9   :  { %v203_v3 = vpop.xlane.xlu1 %202  ;;  %vm240_vm2 = vcmp.ne.f32.partialorder %v694_v61, %v694_v61 }
  0xda   :  { %v264_v4 = vsub.f32 0.0, %v256_v0  ;;  %v258_v5 = vand.u32 2147483647, %v697_v1  ;;  %v700_v7 = vsub.f32 0.0, %v217_v2  ;;  %v219_v8 = vsub.f32 0.0, %v203_v3 }
  0xdb   :  { %v206_v9 = vpop.xlane.xlu0 %205  ;;  %v234_v59 = vmax.f32 %v697_v1, 0.0  ;;  %vm242_vm3 = vcmp.ne.f32.partialorder %v697_v1, %v697_v1 }
  0xdc   :  { %v272_v10 = vmul.f32 1.442695, %v264_v4  ;;  %v266_v11 = vsub.f32 0.0, %v258_v5  ;;  %v220_v12 = vsub.f32 0.0, %v206_v9  ;;  %v257_v13 = vand.u32 2147483647, %v700_v7 }
  0xdd   :  { %v703_v14 = vsub.f32 0.0, %v219_v8  ;;  %v209_v15 = vpop.xlane.xlu1 %208  ;;  %v233_v60 = vmax.f32 %v700_v7, 0.0  ;;  %vm241_vm5 = vcmp.ne.f32.partialorder %v700_v7, %v700_v7 }
  0xde   :  { %503 = vpow2.f32 %v272_v10  ;;  %v276_v16 = vmul.f32 1.442695, %v266_v11  ;;  %v705_v17 = vsub.f32 0.0, %v220_v12  ;;  %v221_v18 = vsub.f32 0.0, %v209_v15 }
  0xdf   :  { %v265_v19 = vsub.f32 0.0, %v257_v13  ;;  %v259_v20 = vand.u32 2147483647, %v703_v14  ;;  %v212_v21 = vpop.xlane.xlu0 %211  ;;  %v235_v0 = vmax.f32 %v703_v14, 0.0  ;;  %vm243_vm7 = vcmp.ne.f32.partialorder %v703_v14, %v703_v14 }
  0xe0   :  { %505 = vpow2.f32 %v276_v16  ;;  %v260_v22 = vand.u32 2147483647, %v705_v17  ;;  %v709_v25 = vsub.f32 0.0, %v221_v18  ;;  %v222_v26 = vsub.f32 0.0, %v212_v21 }
  0xe1   :  { %v274_v23 = vmul.f32 1.442695, %v265_v19  ;;  %v267_v24 = vsub.f32 0.0, %v259_v20  ;;  %v215_v27 = vpop.xlane.xlu1 %214  ;;  %v236_v5 = vmax.f32 %v705_v17, 0.0  ;;  %vm244_vm9 = vcmp.ne.f32.partialorder %v705_v17, %v705_v17 }
  0xe2   :  { %v268_v28 = vsub.f32 0.0, %v260_v22  ;;  %v223_v29 = vsub.f32 0.0, %v215_v27  ;;  %v261_v32 = vand.u32 2147483647, %v709_v25  ;;  %v712_v33 = vsub.f32 0.0, %v222_v26 }
  0xe3   :  { %507 = vpow2.f32 %v274_v23  ;;  %v278_v30 = vmul.f32 1.442695, %v267_v24  ;;  %v237_v18 = vmax.f32 %v709_v25, 0.0  ;;  %vm245_vm15 = vcmp.ne.f32.partialorder %v709_v25, %v709_v25 }
  0xe4   :  { %v280_v31 = vmul.f32 1.442695, %v268_v28  ;;  %v714_v34 = vsub.f32 0.0, %v223_v29  ;;  %v269_v35 = vsub.f32 0.0, %v261_v32  ;;  %v262_v36 = vand.u32 2147483647, %v712_v33 }
  0xe5   :  { %509 = vpow2.f32 %v278_v30 }
  0xe6   :  { %511 = vpow2.f32 %v280_v31  ;;  %v282_v38 = vmul.f32 1.442695, %v269_v35  ;;  %v263_v39 = vand.u32 2147483647, %v714_v34  ;;  %v270_v41 = vsub.f32 0.0, %v262_v36 }
  0xe8   :  { %v504_v37 = vpop.eup %503  ;;  %513 = vpow2.f32 %v282_v38  ;;  %v284_v44 = vmul.f32 1.442695, %v270_v41  ;;  %v271_v45 = vsub.f32 0.0, %v263_v39 }
  0xe9   :  { %v288_v40 = vadd.f32 1.0, %v504_v37  ;;  %v291_v47 = vmul.f32 -0.5, %v504_v37  ;;  %v294_v58 = vand.u32 2147483647, %v504_v37 }
  0xea   :  { %v506_v42 = vpop.eup %505  ;;  %v286_v53 = vmul.f32 1.442695, %v271_v45 }
  0xeb   :  { %515 = vlog2.f32 %v288_v40  ;;  %v306_v43 = vadd.f32 1.0, %v506_v42  ;;  %v309_v51 = vmul.f32 -0.5, %v506_v42  ;;  %v292_v56 = vadd.f32 1.0, %v291_v47 }
  0xec   :  { %v312_v4 = vand.u32 2147483647, %v506_v42  ;;  %vm295_vm4 = vcmp.lt.f32.partialorder %v294_v58, 0.0004427343 }
  0xed   :  { %v508_v46 = vpop.eup %507  ;;  %517 = vlog2.f32 %v306_v43  ;;  %v310_v63 = vadd.f32 1.0, %v309_v51  ;;  %v293_v11 = vmul.f32 %v504_v37, %v292_v56 }
  0xee   :  { %v297_v48 = vadd.f32 1.0, %v508_v46  ;;  %519 = vpow2.f32 %v284_v44  ;;  %v300_v57 = vmul.f32 -0.5, %v508_v46  ;;  %v303_v13 = vand.u32 2147483647, %v508_v46 }
  0xef   :  { %v510_v49 = vpop.eup %509  ;;  %v311_v21 = vmul.f32 %v506_v42, %v310_v63  ;;  %vm313_vm6 = vcmp.lt.f32.partialorder %v312_v4, 0.0004427343 }
  0xf0   :  { %v718_v50 = vpop.eup %511  ;;  %521 = vlog2.f32 %v297_v48  ;;  %v315_v52 = vadd.f32 1.0, %v510_v49  ;;  %v318_v2 = vmul.f32 -0.5, %v510_v49  ;;  %v301_v12 = vadd.f32 1.0, %v300_v57 }
  0xf1   :  { %v324_v54 = vadd.f32 1.0, %v718_v50  ;;  %v327_v8 = vmul.f32 -0.5, %v718_v50  ;;  %v321_v16 = vand.u32 2147483647, %v510_v49  ;;  %vm742_vm8 = vcmp.lt.f32.partialorder %v303_v13, 0.0004427343 }
  0xf2   :  { %523 = vlog2.f32 %v315_v52  ;;  %v726_v62 = vpop.eup %513  ;;  %v319_v22 = vadd.f32 1.0, %v318_v2  ;;  %v302_v30 = vmul.f32 %v508_v46, %v301_v12  ;;  %v330_v38 = vand.u32 2147483647, %v718_v50 }
  0xf3   :  { %525 = vlog2.f32 %v324_v54  ;;  %v333_v9 = vadd.f32 1.0, %v726_v62  ;;  %v328_v26 = vadd.f32 1.0, %v327_v8  ;;  %v336_v27 = vmul.f32 -0.5, %v726_v62 }
  0xf4   :  { %527 = vpow2.f32 %v286_v53  ;;  %vm749_vm11 = vcmp.lt.f32.partialorder %v321_v16, 0.0004427343  ;;  %v320_v41 = vmul.f32 %v510_v49, %v319_v22  ;;  %v339_v42 = vand.u32 2147483647, %v726_v62 }
  0xf5   :  { %v516_v3 = vpop.eup %515  ;;  %529 = vlog2.f32 %v333_v9  ;;  %v329_v46 = vmul.f32 %v718_v50, %v328_v26  ;;  %v337_v47 = vadd.f32 1.0, %v336_v27  ;;  %vm331_vm12 = vcmp.lt.f32.partialorder %v330_v38, 0.0004427343 }
  0xf6   :  { %v290_v10 = vmul.f32 0.6931472, %v516_v3  ;;  %vm773_vm13 = vcmp.lt.f32.partialorder %v339_v42, 0.0004427343  ;;  %v238_v26 = vmax.f32 %v712_v33, 0.0  ;;  %v239_v38 = vmax.f32 %v714_v34, 0.0 }
  0xf7   :  { %v518_v15 = vpop.eup %517  ;;  %v338_v4 = vmul.f32 %v726_v62, %v337_v47 }
  0xf8   :  { %v296_v19 = vsel %vm295_vm4, %v293_v11, %v290_v10  ;;  %v308_v20 = vmul.f32 0.6931472, %v518_v15  ;;  %v737_v23 = vpop.eup %519  ;;  %vm434_vm4 = vcmask 1045509  }
  0xf9   :  { %v360_v24 = vadd.f32 %v296_v19, %v232_v55  ;;  %v342_v32 = vadd.f32 1.0, %v737_v23  ;;  %v345_v49 = vmul.f32 -0.5, %v737_v23  ;;  %v348_v11 = vand.u32 2147483647, %v737_v23 }
  0xfa   :  { %v522_v28 = vpop.eup %521  ;;  %v314_v29 = vsel %vm313_vm6, %v311_v21, %v308_v20  ;;  %vm247_vm6 = vcmp.ne.f32.partialorder %v714_v34, %v714_v34 }
  0xfb   :  { %v362_v35 = vadd.f32 %v314_v29, %v234_v59  ;;  %v299_v36 = vmul.f32 0.6931472, %v522_v28  ;;  %v368_v40 = vsel %vm240_vm2, %v694_v61, %v360_v24  ;;  %531 = vlog2.f32 %v342_v32 }
  0xfc   :  { %v524_v39 = vpop.eup %523  ;;  %v376_v53 = vsub.f32 0.0, %v368_v40  ;;  %vm349_vm1 = vcmp.lt.f32.partialorder %v348_v11, 0.0004427343  ;;  %vm432_vm2 = vcmask 1044484  }
  0xfd   :  { %v526_v43 = vpop.eup %525  ;;  %v305_v44 = vsel %vm742_vm8, %v302_v30, %v299_v36  ;;  %v317_v45 = vmul.f32 0.6931472, %v524_v39  ;;  %v370_v51 = vsel %vm242_vm3, %v697_v1, %v362_v35  ;;  %vm246_vm3 = vcmp.ne.f32.partialorder %v712_v33, %v712_v33 }
  0xfe   :  { %v528_v48 = vpop.eup %527  ;;  %v361_v52 = vadd.f32 %v305_v44, %v233_v60  ;;  %v326_v61 = vmul.f32 0.6931472, %v526_v43  ;;  %v378_v59 = vsub.f32 0.0, %v370_v51  ;;  %vm438_vm8 = vcmask 1047559   ;;  %v72_v51 = vpop.xlane.xlu0 %71 }
  0xff   :  { %v323_v54 = vsel %vm749_vm11, %v320_v41, %v317_v45  ;;  %v351_v55 = vadd.f32 1.0, %v528_v48  ;;  %v530_v1 = vpop.eup %529  ;;  %v357_v29 = vand.u32 2147483647, %v528_v48 }
 0x100   :  { %v369_v50 = vsel %vm241_vm5, %v700_v7, %v361_v52  ;;  %v363_v56 = vadd.f32 %v323_v54, %v235_v0  ;;  %v332_v57 = vsel %vm331_vm12, %v329_v46, %v326_v61  ;;  %v335_v3 = vmul.f32 0.6931472, %v530_v1 }
 0x101   :  { %v377_v60 = vsub.f32 0.0, %v369_v50  ;;  %v364_v63 = vadd.f32 %v332_v57, %v236_v5  ;;  %533 = vlog2.f32 %v351_v55  ;;  %v346_v7 = vadd.f32 1.0, %v345_v49 }
 0x102   :  { %v371_v2 = vsel %vm243_vm7, %v703_v14, %v363_v56  ;;  %v397_v0 = vrot.slane %v376_v53, %v684_v6  ;;  %v341_v10 = vsel %vm773_vm13, %v338_v4, %v335_v3  ;;  %v354_v14 = vmul.f32 -0.5, %v528_v48 }
 0x103   :  { %v401_v8 = vrot.slane %v377_v60, %v684_v6  ;;  %v379_v9 = vsub.f32 0.0, %v371_v2  ;;  %v372_v5 = vsel %vm244_vm9, %v705_v17, %v364_v63  ;;  %v405_v62 = vrot.slane %v378_v59, %v684_v6 }
 0x104   :  { %v380_v12 = vsub.f32 0.0, %v372_v5  ;;  %v365_v13 = vadd.f32 %v341_v10, %v237_v18  ;;  %v347_v21 = vmul.f32 %v737_v23, %v346_v7  ;;  %v355_v18 = vadd.f32 1.0, %v354_v14 }
 0x105   :  { %v427_v15 = vsel %vm426_vm10, %v401_v8, %v397_v0  ;;  %v532_v16 = vpop.eup %531  ;;  %v409_v19 = vrot.slane %v379_v9, %v684_v6  ;;  %vm358_vm5 = vcmp.lt.f32.partialorder %v357_v29, 0.0004427343  ;;  %vm436_vm7 = vcmask 1046534  }
 0x106   :  { %v373_v17 = vsel %vm245_vm15, %v709_v25, %v365_v13  ;;  %v344_v20 = vmul.f32 0.6931472, %v532_v16  ;;  %v429_v22 = vsel %vm428_vm14, %v405_v62, %v427_v15  ;;  %v413_v27 = vrot.slane %v380_v12, %v684_v6 }
 0x107   :  { %v381_v24 = vsub.f32 0.0, %v373_v17  ;;  %v431_v31 = vsel %vm430_vm0, %v409_v19, %v429_v22  ;;  %v356_v35 = vmul.f32 %v528_v48, %v355_v18  ;;  %vm441_vm9 = vcmask 31744  }
 0x108   :  { %v350_v28 = vsel %vm349_vm1, %v347_v21, %v344_v20  ;;  %v433_v39 = vsel %vm432_vm2, %v413_v27, %v431_v31  ;;  %v73_v52 = vsub.f32 0.0, %v72_v51  ;;  %vm453_vm12 = vcmask 7168  }
 0x109   :  { %v366_v30 = vadd.f32 %v350_v28, %v238_v26  ;;  %v417_v36 = vrot.slane %v381_v24, %v684_v6 }
 0x10a   :  { %v77_v61 = vand.u32 2147483647, %v73_v52  ;;  %vm75_vm11 = vcmp.ne.f32.partialorder %v73_v52, %v73_v52 }
 0x10b   :  { %v534_v32 = vpop.eup %533  ;;  %v374_v25 = vsel %vm246_vm3, %v712_v33, %v366_v30  ;;  %v435_v43 = vsel %vm434_vm4, %v417_v36, %v433_v39 }
 0x10c   :  { %v353_v23 = vmul.f32 0.6931472, %v534_v32  ;;  %v382_v37 = vsub.f32 0.0, %v374_v25  ;;  %v78_v49 = vsub.f32 0.0, %v77_v61 }
 0x10e   :  { %v359_v40 = vsel %vm358_vm5, %v356_v35, %v353_v23  ;;  %v421_v42 = vrot.slane %v382_v37, %v684_v6  ;;  %v79_v53 = vmul.f32 1.442695, %v78_v49 }
 0x10f   :  { %v367_v41 = vadd.f32 %v359_v40, %v239_v38 }
 0x110   :  { %v437_v45 = vsel %vm436_vm7, %v421_v42, %v435_v43  ;;  %535 = vpow2.f32 %v79_v53 }
 0x111   :  { %v375_v33 = vsel %vm247_vm6, %v714_v34, %v367_v41 }
 0x112   :  { %v383_v44 = vsub.f32 0.0, %v375_v33 }
 0x114   :  { %v425_v46 = vrot.slane %v383_v44, %v684_v6  ;;  %v74_v6 = vmax.f32 %v73_v52, 0.0 }
 0x116   :  { %v439_v47 = vsel %vm438_vm8, %v425_v46, %v437_v45 }
 0x117   :  { %v442_v48 = vsel %vm441_vm9, %v439_v47, 0.0 }
 0x118   :  { %443 = vadd.xlane.f32.xlu1 %v442_v48 }
 0x11a   :  { %v536_v54 = vpop.eup %535 }
 0x11b   :  { %v81_v55 = vadd.f32 1.0, %v536_v54  ;;  %v84_v50 = vmul.f32 -0.5, %v536_v54  ;;  %v87_v57 = vand.u32 2147483647, %v536_v54 }
 0x11d   :  { %537 = vlog2.f32 %v81_v55  ;;  %v85_v34 = vadd.f32 1.0, %v84_v50  ;;  %vm88_vm10 = vcmp.lt.f32.partialorder %v87_v57, 0.0004427343 }
 0x11f   :  { %v86_v1 = vmul.f32 %v536_v54, %v85_v34 }
 0x127   :  { %v538_v56 = vpop.eup %537 }
 0x128   :  { %v83_v58 = vmul.f32 0.6931472, %v538_v56 }
 0x12a   :  { %v89_v59 = vsel %vm88_vm10, %v86_v1, %v83_v58 }
 0x12b   :  { %v90_v60 = vadd.f32 %v89_v59, %v74_v6 }
 0x12d   :  { %v91_v63 = vsel %vm75_vm11, %v73_v52, %v90_v60 }
 0x12e   :  { %v92_v2 = vsub.f32 0.0, %v91_v63 }
 0x1a5   :  { %v444_v3 = vpop.xlane.xlu1 %443 }
 0x1a6   :  { %v451_v4 = vadd.f32 %v444_v3, %v92_v2 }
 0x1a8   :  { %v454_v7 = vsel %vm453_vm12, %v451_v4, 0.0 }
 0x1a9   :  { %455 = vadd.xlane.f32.xlu0 %v454_v7 }
 0x236   :  { %v456_v0 = vpop.xlane.xlu0 %455 }
 0x237   :  { %v457_v8 = vrot.slane %v456_v0, 4 }
 0x239   :  { %v458_v9 = vadd.f32 %v457_v8, %v456_v0 }
 0x23b   :  { %v459_v5 = vrot.slane %v458_v9, 2 }
 0x23d   :  { %v460_v10 = vadd.f32 %v459_v5, %v458_v9 }
 0x23f   :  { %v461_v11 = vrot.slane %v460_v10, 1 }
 0x241   :  { %v462_v14 = vadd.f32 %v461_v11, %v460_v10 }
 0x243   :  { %493 = vpush %v462_v14 }
 0x274   :  { %s494_s2 = spop %493 }
 0x275   :  { %s474_s21 = smul.f32 0.125, %s494_s2 }
 0x277   :  { %s475_s22 = ssub.f32 0.0, %s474_s21 }
 0x279   :  { %477 = sst [smem:[#allocation9]] %s475_s22 }
 0x27a   :  { %614 = shalt.err (!%p611_p12)
}
 0x27b   :  { %s627_s30 = smov [#allocation9]  }
 0x27c   :  { %485 = dma.smem_to_hbm %s627_s30, 16, %s827_s3, [#allocation5]  }
 0x27d   :  { %619 = dma.done.wait [#allocation5], 16  }
 0x27e   :  { %620 = vsyncadd [#allocation5], 4294967280 }
 0x27f   :  { %489 = sfence }
 0x280   :  { %490 = vsyncpa [#allocation4], 1 }
 0x281   :  { %491 = vsyncpa [#allocation7], 1 }
 0x282   :  { %492 = vsyncpa [#allocation5], 1 }

</bundles_post_ra>
